<compile_context>
chip_gen: v6e
topology: v6e:2x2x1
jax: 0.10.0
libtpu: 0.0.40
codegen_flags: <defaults>
</compile_context>

<pallas_src>
import jax
import jax.numpy as jnp
from jax.experimental import pallas as pl
from jax.experimental.pallas import tpu as pltpu

P_DROP = 0.1
KEEP_P = 1.0 - P_DROP
INV_KEEP = 1.0 / KEEP_P

LANE = 512            # lane-dense slab width (multiple of 128)
MAX_BLOCK_ROWS = 512  # (512, 512) f32 tile = 1 MiB per operand per grid step


def _dropout_kernel(x_ref, u_ref, o_ref):
    # Keep an element iff its uniform draw in [0, 1) is < keep_p (prob = 0.9);
    # survivors are scaled by 1/keep_p, dropped elements become exactly 0.
    x = x_ref[...]
    keep = u_ref[...] < jnp.float32(KEEP_P)
    scaled = x * jnp.asarray(INV_KEEP, dtype=x.dtype)
    o_ref[...] = jnp.where(keep, scaled, jnp.zeros_like(x))


def _round_up(a, b):
    return ((a + b - 1) // b) * b


def dropout_pallas(x, key):
    """Dropout(p=0.1) forward pass (training semantics) via a tiled Pallas kernel."""
    orig_shape = x.shape
    orig_dtype = x.dtype
    flat = x.reshape(-1)
    n = flat.shape[0]

    rows = pl.cdiv(n, LANE)
    # Block second-to-last dim must be a multiple of 8 (or the full dim).
    block_rows = min(MAX_BLOCK_ROWS, _round_up(rows, 8))
    padded_rows = _round_up(rows, block_rows)
    padded_n = padded_rows * LANE
    if padded_n != n:
        flat = jnp.pad(flat, (0, padded_n - n))
    x2d = flat.reshape(padded_rows, LANE)

    # Uniform draws generated host-side with the JAX PRNG (portable across
    # Mosaic TPU lowering and the CPU/interpret fallback).
    u2d = jax.random.uniform(key, (padded_rows, LANE), dtype=jnp.float32)

    grid = (padded_rows // block_rows,)
    spec = pl.BlockSpec((block_rows, LANE), lambda i: (i, 0))

    # Mark the tile axis parallel so v7x's 2 TensorCores shard it; no-op on
    # single-core v5e/v6e. (Graceful fallback for older jax naming.)
    cp_cls = getattr(pltpu, "CompilerParams", None) or getattr(
        pltpu, "TPUCompilerParams", None
    )
    compiler_params = (
        cp_cls(dimension_semantics=("parallel",)) if cp_cls is not None else None
    )

    out2d = pl.pallas_call(
        _dropout_kernel,
        grid=grid,
        in_specs=[spec, spec],
        out_specs=spec,
        out_shape=jax.ShapeDtypeStruct((padded_rows, LANE), orig_dtype),
        compiler_params=compiler_params,
    )(x2d, u2d)

    return out2d.reshape(-1)[:n].reshape(orig_shape)


if __name__ == "__main__":
    # Small shape consistent with the module's 4-D NCHW input [1, 4, 384, 384]:
    # use [2, 4, 16, 16] (2048 elements).
    key = jax.random.PRNGKey(0)
    xkey, dkey = jax.random.split(key)
    x = jax.random.normal(xkey, (2, 4, 16, 16), dtype=jnp.float32)

    out = dropout_pallas(x, dkey)
    out = jax.block_until_ready(out)

    # Sanity: same shape/dtype; survivors equal x / 0.9; the rest are exactly 0.
    assert out.shape == x.shape and out.dtype == x.dtype
    kept = out != 0.0
    expected = x / KEEP_P
    assert bool(
        jnp.allclose(
            jnp.where(kept, out, 0.0), jnp.where(kept, expected, 0.0), atol=1e-5
        )
    )
    frac_dropped = 1.0 - float(jnp.mean(kept.astype(jnp.float32)))
    assert 0.02 < frac_dropped < 0.25  # ~p = 0.1 expected

    print("KERNEL_OK")
</pallas_src>

<mosaic_0001>
module attributes {stable_mosaic.version = 11 : i64} {
  func.func @_dropout_kernel(%arg0: i32, %arg1: memref<8x512xf32, #tpu.memory_space<vmem>>, %arg2: memref<8x512xf32, #tpu.memory_space<vmem>>, %arg3: memref<8x512xf32, #tpu.memory_space<vmem>>) attributes {dimension_semantics = [#tpu.dimension_semantics<parallel>], iteration_bounds = array<i64: 1>, scalar_prefetch = 0 : i64, scratch_operands = 0 : i64, tpu.core_type = #tpu.core_type<tc>, window_params = [{transform_indices = @transform_0, window_bounds = array<i64: 8, 512>}, {transform_indices = @transform_1, window_bounds = array<i64: 8, 512>}, {transform_indices = @transform_2, window_bounds = array<i64: 8, 512>}]} {
    %c0 = arith.constant 0 : index
    %c0_0 = arith.constant 0 : index
    %0 = vector.load %arg1[%c0, %c0_0] : memref<8x512xf32, #tpu.memory_space<vmem>>, vector<8x512xf32>
    %c0_1 = arith.constant 0 : index
    %c0_2 = arith.constant 0 : index
    %1 = vector.load %arg2[%c0_1, %c0_2] : memref<8x512xf32, #tpu.memory_space<vmem>>, vector<8x512xf32>
    %cst = arith.constant 0.899999976 : f32
    %2 = vector.broadcast %cst : f32 to vector<8x512xf32>
    %3 = arith.cmpf olt, %1, %2 : vector<8x512xf32>
    %cst_3 = arith.constant 1.11111116 : f32
    %4 = vector.broadcast %cst_3 : f32 to vector<8x512xf32>
    %5 = arith.mulf %0, %4 : vector<8x512xf32>
    %cst_4 = arith.constant 0.000000e+00 : f32
    %6 = vector.broadcast %cst_4 : f32 to vector<8x512xf32>
    %7 = arith.select %3, %5, %6 : vector<8x512xi1>, vector<8x512xf32>
    %c0_5 = arith.constant 0 : index
    %c0_6 = arith.constant 0 : index
    %8 = vector.load %arg3[%c0_5, %c0_6] : memref<8x512xf32, #tpu.memory_space<vmem>>, vector<8x512xf32>
    tpu.vector_store %arg3[%c0_5, %c0_6], %7 {strides = array<i32>} : memref<8x512xf32, #tpu.memory_space<vmem>>, vector<8x512xf32>,
    return
  }
  func.func @transform_0(%arg0: i32) -> (i32, i32) {
    %c0_i32 = arith.constant 0 : i32
    %c0_i32_0 = arith.constant 0 : i32
    return %arg0, %c0_i32 : i32, i32
  }
  func.func @transform_1(%arg0: i32) -> (i32, i32) {
    %c0_i32 = arith.constant 0 : i32
    %c0_i32_0 = arith.constant 0 : i32
    return %arg0, %c0_i32 : i32, i32
  }
  func.func @transform_2(%arg0: i32) -> (i32, i32) {
    %c0_i32 = arith.constant 0 : i32
    %c0_i32_0 = arith.constant 0 : i32
    return %arg0, %c0_i32 : i32, i32
  }
}

</mosaic_0001>

<bundles_post_ra>
// kernel: tpu_custom_call.1
= control target key start
LH: loop header
LB: loop body
LE: loop exit
PB: predicated region body
PF: predicated region fallthrough
CT: control target
= control target key end

     0   :  { %7 = vsyncpa [#allocation3], 0  ;;  %s172_s0 = inlined_call_operand.hbm [shape: f32[8,512], index: 0, kind: input, shape index: {}]   ;;  %s173_s1 = inlined_call_operand.hbm [shape: f32[8,512], index: 1, kind: input, shape index: {}]   ;;  %s174_s2 = inlined_call_operand.hbm [shape: f32[8,512], index: 2, kind: output, shape index: {}]  }
   0x1   :  { %8 = vsyncpa [#allocation6], 0 }
   0x2   :  { %9 = vsyncpa [#allocation4], 0  ;;  %s145_s9 = smov [#allocation2]   ;;  %s146_s11 = smov [#allocation5]  }
   0x3   :  { %s16_s10 = sshll.u32 %s145_s9, 4  ;;  %s26_s12 = sshll.u32 %s146_s11, 4  ;;  %s17_s10 = int_to_ptr.vmem [resolvable:$true] %s16_s10  ;;  %s27_s12 = int_to_ptr.vmem [resolvable:$true] %s26_s12 }
   0x4   :  { %s87_s13 = scalar_lea.vmem %s17_s10, 512  ;;  %p92_p1 = scmp.lt.s32.totalorder %s17_s10, %s17_s10 }
   0x5   :  { %p88_p0 = scmp.ne.s32.totalorder %s17_s10, %s87_s13  ;;  %p93_p2 = scmp.lt.s32.totalorder %s87_s13, %s87_s13 }
   0x7   :  { %p94_p3 = por %p93_p2, %p92_p1 }
   0x9   :  { %p95_p4 = pnand %p94_p3, %p88_p0 }
   0xb   :  { %98 = shalt.err (!%p95_p4)
}
   0xc   :  { %19 = dma.hbm_to_vmem [thread:$0]  %s172_s0, 512, %s17_s10, [#allocation3]  }
   0xd   :  { %s107_s16 = scalar_lea.vmem %s27_s12, 512  ;;  %p112_p6 = scmp.lt.s32.totalorder %s27_s12, %s27_s12 }
   0xe   :  { %p108_p5 = scmp.ne.s32.totalorder %s27_s12, %s107_s16  ;;  %p113_p7 = scmp.lt.s32.totalorder %s107_s16, %s107_s16 }
  0x10   :  { %p114_p8 = por %p113_p7, %p112_p6 }
  0x12   :  { %p115_p9 = pnand %p114_p8, %p108_p5 }
  0x14   :  { %118 = shalt.err (!%p115_p9)
}
  0x15   :  { %29 = dma.hbm_to_vmem [thread:$0]  %s173_s1, 512, %s27_s12, [#allocation6]  }
  0x16   :  { %139 = dma.done.wait [#allocation3], 512  }
  0x17   :  { %140 = vsyncadd [#allocation3], 4294966784 }
  0x18   :  { %141 = dma.done.wait [#allocation6], 512  }
  0x19   :  { %142 = vsyncadd [#allocation6], 4294966784  ;;  %v36_v0 = vld [vmem:[#allocation2] sm:$0xff]  ;;  %v37_v2 = vld [vmem:[#allocation2 + $0x8] sm:$0xff]  ;;  %s147_s19 = smov [#allocation7]  }
  0x1a   :  { %v40_v1 = vld [vmem:[#allocation5] sm:$0xff]  ;;  %s66_s0 = sshll.u32 %s147_s19, 4  ;;  %v48_v3 = vmul.f32 1.1111112, %v36_v0  ;;  %v41_v4 = vld [vmem:[#allocation5 + $0x8] sm:$0xff]  ;;  %v38_v5 = vld [vmem:[#allocation2 + $0x10] sm:$0xff]  ;;  %s67_s0 = int_to_ptr.vmem [resolvable:$true] %s66_s0 }
  0x1b   :  { %vm44_vm0 = vcmp.lt.f32.partialorder %v40_v1, 0.9  ;;  %vm45_vm1 = vcmp.lt.f32.partialorder %v41_v4, 0.9  ;;  %v49_v6 = vmul.f32 1.1111112, %v37_v2  ;;  %p124_p11 = scmp.lt.s32.totalorder %s67_s0, %s67_s0 }
  0x1c   :  { %v42_v7 = vld [vmem:[#allocation5 + $0x10] sm:$0xff]  ;;  %v39_v8 = vld [vmem:[#allocation2 + $0x18] sm:$0xff]  ;;  %v52_v9 = vsel %vm44_vm0, %v48_v3, 0.0  ;;  %v50_v10 = vmul.f32 1.1111112, %v38_v5  ;;  %s119_s1 = scalar_lea.vmem %s67_s0, 512 }
  0x1d   :  { %vm46_vm2 = vcmp.lt.f32.partialorder %v42_v7, 0.9  ;;  %v43_v11 = vld [vmem:[#allocation5 + $0x18] sm:$0xff]  ;;  %56 = vst [vmem:[#allocation7] sm:$0xff] %v52_v9  ;;  %v53_v12 = vsel %vm45_vm1, %v49_v6, 0.0  ;;  %p120_p10 = scmp.ne.s32.totalorder %s67_s0, %s119_s1  ;;  %p125_p12 = scmp.lt.s32.totalorder %s119_s1, %s119_s1 }
  0x1e   :  { %vm47_vm3 = vcmp.lt.f32.partialorder %v43_v11, 0.9  ;;  %v51_v13 = vmul.f32 1.1111112, %v39_v8  ;;  %57 = vst [vmem:[#allocation7 + $0x8] sm:$0xff] %v53_v12  ;;  %v54_v14 = vsel %vm46_vm2, %v50_v10, 0.0 }
  0x1f   :  { %58 = vst [vmem:[#allocation7 + $0x10] sm:$0xff] %v54_v14  ;;  %p126_p13 = por %p125_p12, %p124_p11 }
  0x20   :  { %v55_v15 = vsel %vm47_vm3, %v51_v13, 0.0 }
  0x21   :  { %59 = vst [vmem:[#allocation7 + $0x18] sm:$0xff] %v55_v15  ;;  %p127_p0 = pnand %p126_p13, %p120_p10 }
  0x23   :  { %130 = shalt.err (!%p127_p0)
}
  0x24   :  { %69 = dma.vmem_to_hbm [thread:$0]  %s67_s0, 512, %s174_s2, [#allocation4]  }
  0x25   :  { %143 = dma.done.wait [#allocation4], 512  }
  0x26   :  { %144 = vsyncadd [#allocation4], 4294966784 }
  0x27   :  { %73 = vsyncpa [#allocation3], 1 }
  0x28   :  { %74 = vsyncpa [#allocation6], 1 }
  0x29   :  { %75 = vsyncpa [#allocation4], 1 }

</bundles_post_ra>
